<compile_context>
chip_gen: v7x
topology: tpu7x:2x2x1
jax: 0.10.0
libtpu: 0.0.40
codegen_flags: <defaults>
</compile_context>

<pallas_src>
import functools

import jax
import jax.numpy as jnp
import numpy as np
from jax.experimental import pallas as pl
from jax.experimental.pallas import tpu as pltpu


def _round_up(x, m):
    return (x + m - 1) // m * m


def _filter_corr_kernel(x_ref, mp_ref, out_ref, g_acc, s1_acc, s2_acc,
                        *, n, d, n_pad):
    """Grid = (layer, k).  See module docstring for the math."""
    k = pl.program_id(1)

    @pl.when(k == 0)
    def _init():
        g_acc[...] = jnp.zeros_like(g_acc)
        s1_acc[...] = jnp.zeros_like(s1_acc)
        s2_acc[...] = jnp.zeros_like(s2_acc)

    # bf16 operands run the MXU at full rate; the row statistics are
    # accumulated from the same rounded values so the analytic diagonal below
    # matches the Gram diagonal (the bf16 error cancels in the subtraction).
    xb = x_ref[0].astype(jnp.bfloat16)                     # (N_pad, TD)
    xf = xb.astype(jnp.float32)
    g_acc[...] += jax.lax.dot_general(
        xb, xb, dimension_numbers=(((1,), (1,)), ((), ())),
        preferred_element_type=jnp.float32)
    s1_acc[...] += jnp.sum(xf, axis=1, keepdims=True)
    s2_acc[...] += jnp.sum(xf * xf, axis=1, keepdims=True)

    @pl.when(k == pl.num_programs(1) - 1)
    def _finalize():
        s1 = s1_acc[...]                                   # (N_pad, 1)
        s2 = s2_acc[...]
        mean = s1 * (1.0 / d)
        ssq = s2 - s1 * mean                               # sum((x - mean)^2)
        var = ssq * (1.0 / (d - 1))                        # unbiased (torch default)
        # zero-variance guard (the reference would emit NaN plus a warning).
        inv_std = jax.lax.rsqrt(jnp.maximum(var, 1e-30))
        if n < n_pad:                                      # trace-time branch
            row = jax.lax.broadcasted_iota(jnp.int32, (n_pad, 1), 0)
            inv_std = jnp.where(row < n, inv_std, 0.0)     # kill padded filters

        # Rank-1 corrections (d*mu_i*mu_j and w_i*w_j) as tiny K=8 matmuls:
        # column 0 carries the vector, columns 1..7 are zero.
        col0 = jax.lax.broadcasted_iota(jnp.int32, (n_pad, 8), 1) == 0
        mean_p = jnp.where(col0, mean, 0.0)
        s1_p = jnp.where(col0, s1, 0.0)
        w_p = jnp.where(col0, inv_std, 0.0)
        dn = (((1,), (1,)), ((), ()))
        outer_mu = jax.lax.dot_general(mean_p, s1_p, dn,
                                       preferred_element_type=jnp.float32)
        outer_w = jax.lax.dot_general(w_p, w_p, dn,
                                      preferred_element_type=jnp.float32)
        corr = (g_acc[...] - outer_mu) * outer_w           # (N_pad, N_pad)

        # Off-diagonal sum of squares without an NxN eye mask: subtract the
        # analytic diagonal (== corr_ii, ~= d-1 for valid rows).
        diag = ssq * (inv_std * inv_std)                   # (N_pad, 1)
        row_sq = jnp.sum(corr * corr, axis=1, keepdims=True)
        scores = (row_sq - diag * diag) * (1.0 / (n - 1))  # (N_pad, 1)

        weighted = scores * mp_ref[0]                      # padded rows give 0
        out_ref[0] = jnp.sum(weighted, axis=0, keepdims=True) * (1.0 / n)


def _batched_filter_correlation(x_stack, mp_stack):
    """x_stack: (L, n, d) flattened filters; mp_stack: (L, n) gate probs.
    Returns (L,) per-layer correlation losses with a single pallas_call."""
    num_layers, n, d = x_stack.shape
    assert n >= 2 and d >= 2, "need >= 2 filters with >= 2 weights each"

    n_pad = max(_round_up(n, 8), 8)
    d_pad = max(_round_up(d, 128), 128)
    x_stack = x_stack.astype(jnp.float32)
    mp_stack = mp_stack.astype(jnp.float32)
    # Zero-pad only when the shape is not (8,128)-aligned: the kernel relies on
    # padded rows/lanes being exactly zero.  Common conv shapes (e.g. 512x4608)
    # are already aligned and pay no extra HBM copy.
    if (n_pad, d_pad) != (n, d):
        x_stack = jnp.pad(x_stack, ((0, 0), (0, n_pad - n), (0, d_pad - d)))
    if n_pad != n:
        mp_stack = jnp.pad(mp_stack, ((0, 0), (0, n_pad - n)))
    mp_stack = mp_stack.reshape(num_layers, n_pad, 1)

    # K-tile the reduction (D) axis so only corr + 2 x-tiles live in VMEM.
    if d_pad <= 1024:
        td = d_pad
    else:
        td = next(t for t in (1024, 512, 256, 128) if d_pad % t == 0)
    kt = d_pad // td

    est = (2 * n_pad * td * 4          # double-buffered x tile
           + 3 * n_pad * n_pad * 4     # Gram accumulator + finalize temporaries
           + 6 * n_pad * 4             # s1/s2/mp columns
           + (1 << 16))
    vmem_limit = int(min(max(2 * est, 16 << 20), 64 << 20))
    # TODO(synk): for very large filter counts (n_pad >~ 1024) add N-row tiling
    # of the Gram accumulator (per-core partials) so it fits v7x's smaller VMEM.

    out = pl.pallas_call(
        functools.partial(_filter_corr_kernel, n=n, d=d, n_pad=n_pad),
        out_shape=jax.ShapeDtypeStruct((num_layers, 1, 1), jnp.float32),
        grid_spec=pltpu.PrefetchScalarGridSpec(
            num_scalar_prefetch=0,
            grid=(num_layers, kt),
            in_specs=[
                pl.BlockSpec((1, n_pad, td), lambda l, k: (l, 0, k)),
                pl.BlockSpec((1, n_pad, 1), lambda l, k: (l, 0, 0)),
            ],
            out_specs=pl.BlockSpec((1, 1, 1), lambda l, k: (l, 0, 0)),
            scratch_shapes=[
                pltpu.VMEM((n_pad, n_pad), jnp.float32),   # Gram accumulator
                pltpu.VMEM((n_pad, 1), jnp.float32),       # sum(x)
                pltpu.VMEM((n_pad, 1), jnp.float32),       # sum(x^2)
            ]),
        compiler_params=pltpu.CompilerParams(
            dimension_semantics=("parallel", "arbitrary"),
            vmem_limit_bytes=vmem_limit),
    )(x_stack, mp_stack)
    return out[:, 0, 0]


def filter_correlation_loss(filters, mask_probs):
    """Single-layer convenience wrapper (gate probs precomputed)."""
    n = filters.shape[0]
    d = int(np.prod(filters.shape[1:]))
    return _batched_filter_correlation(filters.reshape(1, n, d),
                                       mask_probs.reshape(1, n))[0]


def gumbel_softmax_class1(key, logits, tau):
    """F.gumbel_softmax(logits, tau, hard=False, dim=1)[:, 1, 0, 0] for (N,2,1,1)."""
    u = jax.random.uniform(key, logits.shape, minval=1e-10, maxval=1.0)
    g = -jnp.log(-jnp.log(u))
    y = jax.nn.softmax((logits + g) / tau, axis=1)
    return y[:, 1, 0, 0]                                   # (N,)


def mask_loss(layers, mask_probs_per_layer):
    """MaskLoss.forward: layers with identical filter shapes share one launch."""
    # TODO(synk): the reference's NaN/Inf warning checks are host-side
    # diagnostics and are not reproduced in the kernel.
    groups = {}
    for layer, mp in zip(layers, mask_probs_per_layer):
        w = jnp.asarray(layer["weight"])
        n = w.shape[0]
        d = int(np.prod(w.shape[1:]))
        groups.setdefault((n, d), []).append((w.reshape(n, d), jnp.asarray(mp)))
    total = jnp.float32(0.0)
    count = 0
    for (_, _), items in groups.items():
        x_stack = jnp.stack([x for x, _ in items])
        mp_stack = jnp.stack([m for _, m in items])
        total = total + jnp.sum(_batched_filter_correlation(x_stack, mp_stack))
        count += len(items)
    return total / float(count)


# pure-JAX reference of compute_filter_correlation (given the same gate probs)
def _ref_filter_correlation(filters, mask_probs):
    n = filters.shape[0]
    xf = filters.reshape(n, -1).astype(jnp.float32)
    mean = jnp.mean(xf, axis=1, keepdims=True)
    centered = xf - mean
    std = jnp.sqrt(jnp.sum(centered ** 2, axis=1, keepdims=True) /
                   (xf.shape[1] - 1))
    xn = centered / std
    corr = xn @ xn.T
    mask = 1.0 - jnp.eye(n, dtype=jnp.float32)
    scores = jnp.sum((corr * mask) ** 2, axis=1) / (n - 1)
    return jnp.mean(scores * mask_probs)


if __name__ == "__main__":
    key = jax.random.PRNGKey(0)

    # synthetic model: 2 SoftMaskedConv2d-like layers
    # weight: (num_filters=8, in_ch=4, kH=3, kW=3); mask_weight: (8, 2, 1, 1)
    num_layers = 2
    layers = []
    for i in range(num_layers):
        kw, km = jax.random.split(jax.random.fold_in(key, i))
        layers.append(dict(
            weight=0.1 * jax.random.normal(kw, (8, 4, 3, 3), jnp.float32),
            mask_weight=jax.random.normal(km, (8, 2, 1, 1), jnp.float32),
            gumbel_temperature=1.0,
        ))

    # gumbel-softmax gate probabilities (glue, shared between kernel and reference)
    mask_probs_per_layer = []
    for i, layer in enumerate(layers):
        kg = jax.random.fold_in(jax.random.PRNGKey(1234), i)
        mask_probs_per_layer.append(
            gumbel_softmax_class1(kg, layer["mask_weight"],
                                  layer["gumbel_temperature"]))

    total_loss = mask_loss(layers, mask_probs_per_layer)
    total_loss = jax.block_until_ready(total_loss)

    ref = sum(_ref_filter_correlation(l["weight"], mp)
              for l, mp in zip(layers, mask_probs_per_layer)) / num_layers
    np.testing.assert_allclose(np.asarray(total_loss), np.asarray(ref),
                               rtol=2e-2, atol=1e-2)

    print("KERNEL_OK")
</pallas_src>

<mosaic_0001>
module attributes {stable_mosaic.version = 11 : i64} {
  func.func @_filter_corr_kernel(%arg0: i32, %arg1: i32, %arg2: memref<1x8x128xf32, #tpu.memory_space<vmem>>, %arg3: memref<1x8x1xf32, #tpu.memory_space<vmem>>, %arg4: memref<1x1x1xf32, #tpu.memory_space<vmem>>, %arg5: memref<8x8xf32, #tpu.memory_space<vmem>>, %arg6: memref<8x1xf32, #tpu.memory_space<vmem>>, %arg7: memref<8x1xf32, #tpu.memory_space<vmem>>) attributes {dimension_semantics = [#tpu.dimension_semantics<parallel>, #tpu.dimension_semantics<arbitrary>], iteration_bounds = array<i64: 2, 1>, scalar_prefetch = 0 : i64, scratch_operands = 3 : i64, tpu.core_type = #tpu.core_type<tc>, window_params = [{transform_indices = @transform_0, window_bounds = array<i64: 1, 8, 128>}, {transform_indices = @transform_1, window_bounds = array<i64: 1, 8, 1>}, {transform_indices = @transform_2, window_bounds = array<i64: 1, 1, 1>}]} {
    %c0_i32 = arith.constant 0 : i32
    %0 = arith.cmpi eq, %arg1, %c0_i32 : i32
    %1 = arith.extui %0 : i1 to i32
    %c0_i32_0 = arith.constant 0 : i32
    %2 = arith.cmpi ne, %1, %c0_i32_0 : i32
    scf.if %2 {
      %cst_19 = arith.constant 0.000000e+00 : f32
      %25 = vector.broadcast %cst_19 : f32 to vector<8x8xf32>
      %c0_20 = arith.constant 0 : index
      %c0_21 = arith.constant 0 : index
      %26 = vector.load %arg5[%c0_20, %c0_21] : memref<8x8xf32, #tpu.memory_space<vmem>>, vector<8x8xf32>
      tpu.vector_store %arg5[%c0_20, %c0_21], %25 {strides = array<i32>} : memref<8x8xf32, #tpu.memory_space<vmem>>, vector<8x8xf32>,
      %cst_22 = arith.constant 0.000000e+00 : f32
      %27 = vector.broadcast %cst_22 : f32 to vector<8x1xf32>
      %c0_23 = arith.constant 0 : index
      %c0_24 = arith.constant 0 : index
      %28 = vector.load %arg6[%c0_23, %c0_24] : memref<8x1xf32, #tpu.memory_space<vmem>>, vector<8x1xf32>
      tpu.vector_store %arg6[%c0_23, %c0_24], %27 {strides = array<i32>} : memref<8x1xf32, #tpu.memory_space<vmem>>, vector<8x1xf32>,
      %cst_25 = arith.constant 0.000000e+00 : f32
      %29 = vector.broadcast %cst_25 : f32 to vector<8x1xf32>
      %c0_26 = arith.constant 0 : index
      %c0_27 = arith.constant 0 : index
      %30 = vector.load %arg7[%c0_26, %c0_27] : memref<8x1xf32, #tpu.memory_space<vmem>>, vector<8x1xf32>
      tpu.vector_store %arg7[%c0_26, %c0_27], %29 {strides = array<i32>} : memref<8x1xf32, #tpu.memory_space<vmem>>, vector<8x1xf32>,
    } else {
    }
    %c0 = arith.constant 0 : index
    %c0_1 = arith.constant 0 : index
    %c0_2 = arith.constant 0 : index
    %3 = vector.load %arg2[%c0, %c0_1, %c0_2] : memref<1x8x128xf32, #tpu.memory_space<vmem>>, vector<1x8x128xf32>
    %4 = vector.shape_cast %3 : vector<1x8x128xf32> to vector<8x128xf32>
    %5 = arith.truncf %4 : vector<8x128xf32> to vector<8x128xbf16>
    %6 = arith.extf %5 : vector<8x128xbf16> to vector<8x128xf32>
    %c0_3 = arith.constant 0 : index
    %c0_4 = arith.constant 0 : index
    %7 = vector.load %arg5[%c0_3, %c0_4] : memref<8x8xf32, #tpu.memory_space<vmem>>, vector<8x8xf32>
    %cst = arith.constant dense<0.000000e+00> : vector<8x8xf32>
    %8 = tpu.matmul %5, %5, %cst {dimension_numbers = #tpu.dot_dimension_numbers<[1], [1], [0], [0], [0, 0, 1, 0], [], []>} : vector<8x128xbf16>, vector<8x128xbf16>, vector<8x8xf32> -> vector<8x8xf32>
    %9 = arith.addf %7, %8 : vector<8x8xf32>
    %c0_5 = arith.constant 0 : index
    %c0_6 = arith.constant 0 : index
    %10 = vector.load %arg5[%c0_5, %c0_6] : memref<8x8xf32, #tpu.memory_space<vmem>>, vector<8x8xf32>
    tpu.vector_store %arg5[%c0_5, %c0_6], %9 {strides = array<i32>} : memref<8x8xf32, #tpu.memory_space<vmem>>, vector<8x8xf32>,
    %c0_7 = arith.constant 0 : index
    %c0_8 = arith.constant 0 : index
    %11 = vector.load %arg6[%c0_7, %c0_8] : memref<8x1xf32, #tpu.memory_space<vmem>>, vector<8x1xf32>
    %cst_9 = arith.constant dense<0.000000e+00> : vector<8xf32>
    %12 = vector.multi_reduction <add>, %6, %cst_9 [1] : vector<8x128xf32> to vector<8xf32>
    %13 = vector.shape_cast %12 : vector<8xf32> to vector<8x1xf32>
    %14 = arith.addf %11, %13 : vector<8x1xf32>
    %c0_10 = arith.constant 0 : index
    %c0_11 = arith.constant 0 : index
    %15 = vector.load %arg6[%c0_10, %c0_11] : memref<8x1xf32, #tpu.memory_space<vmem>>, vector<8x1xf32>
    tpu.vector_store %arg6[%c0_10, %c0_11], %14 {strides = array<i32>} : memref<8x1xf32, #tpu.memory_space<vmem>>, vector<8x1xf32>,
    %c0_12 = arith.constant 0 : index
    %c0_13 = arith.constant 0 : index
    %16 = vector.load %arg7[%c0_12, %c0_13] : memref<8x1xf32, #tpu.memory_space<vmem>>, vector<8x1xf32>
    %17 = arith.mulf %6, %6 : vector<8x128xf32>
    %cst_14 = arith.constant dense<0.000000e+00> : vector<8xf32>
    %18 = vector.multi_reduction <add>, %17, %cst_14 [1] : vector<8x128xf32> to vector<8xf32>
    %19 = vector.shape_cast %18 : vector<8xf32> to vector<8x1xf32>
    %20 = arith.addf %16, %19 : vector<8x1xf32>
    %c0_15 = arith.constant 0 : index
    %c0_16 = arith.constant 0 : index
    %21 = vector.load %arg7[%c0_15, %c0_16] : memref<8x1xf32, #tpu.memory_space<vmem>>, vector<8x1xf32>
    tpu.vector_store %arg7[%c0_15, %c0_16], %20 {strides = array<i32>} : memref<8x1xf32, #tpu.memory_space<vmem>>, vector<8x1xf32>,
    %c0_i32_17 = arith.constant 0 : i32
    %22 = arith.cmpi eq, %arg1, %c0_i32_17 : i32
    %23 = arith.extui %22 : i1 to i32
    %c0_i32_18 = arith.constant 0 : i32
    %24 = arith.cmpi ne, %23, %c0_i32_18 : i32
    scf.if %24 {
      %c0_19 = arith.constant 0 : index
      %c0_20 = arith.constant 0 : index
      %25 = vector.load %arg6[%c0_19, %c0_20] : memref<8x1xf32, #tpu.memory_space<vmem>>, vector<8x1xf32>
      %c0_21 = arith.constant 0 : index
      %c0_22 = arith.constant 0 : index
      %26 = vector.load %arg7[%c0_21, %c0_22] : memref<8x1xf32, #tpu.memory_space<vmem>>, vector<8x1xf32>
      %cst_23 = arith.constant 0.027777778 : f32
      %27 = vector.broadcast %cst_23 : f32 to vector<8x1xf32>
      %28 = arith.mulf %25, %27 : vector<8x1xf32>
      %29 = arith.mulf %25, %28 : vector<8x1xf32>
      %30 = arith.subf %26, %29 : vector<8x1xf32>
      %cst_24 = arith.constant 0.0285714287 : f32
      %31 = vector.broadcast %cst_24 : f32 to vector<8x1xf32>
      %32 = arith.mulf %30, %31 : vector<8x1xf32>
      %cst_25 = arith.constant 1.000000e-30 : f32
      %33 = vector.broadcast %cst_25 : f32 to vector<8x1xf32>
      %34 = arith.maximumf %32, %33 : vector<8x1xf32>
      %35 = math.rsqrt %34 : vector<8x1xf32>
      %36 = tpu.iota {dimensions = array<i32: 1>} : vector<8x8xi32>
      %c0_i32_26 = arith.constant 0 : i32
      %37 = vector.broadcast %c0_i32_26 : i32 to vector<8x8xi32>
      %38 = arith.cmpi eq, %36, %37 : vector<8x8xi32>
      %cst_27 = arith.constant 0.000000e+00 : f32
      %39 = vector.shape_cast %28 : vector<8x1xf32> to vector<8x1xf32>
      %40 = vector.broadcast %39 : vector<8x1xf32> to vector<8x8xf32>
      %41 = vector.broadcast %cst_27 : f32 to vector<8x8xf32>
      %42 = arith.select %38, %40, %41 : vector<8x8xi1>, vector<8x8xf32>
      %cst_28 = arith.constant 0.000000e+00 : f32
      %43 = vector.shape_cast %25 : vector<8x1xf32> to vector<8x1xf32>
      %44 = vector.broadcast %43 : vector<8x1xf32> to vector<8x8xf32>
      %45 = vector.broadcast %cst_28 : f32 to vector<8x8xf32>
      %46 = arith.select %38, %44, %45 : vector<8x8xi1>, vector<8x8xf32>
      %cst_29 = arith.constant 0.000000e+00 : f32
      %47 = vector.shape_cast %35 : vector<8x1xf32> to vector<8x1xf32>
      %48 = vector.broadcast %47 : vector<8x1xf32> to vector<8x8xf32>
      %49 = vector.broadcast %cst_29 : f32 to vector<8x8xf32>
      %50 = arith.select %38, %48, %49 : vector<8x8xi1>, vector<8x8xf32>
      %cst_30 = arith.constant dense<0.000000e+00> : vector<8x8xf32>
      %51 = tpu.matmul %42, %46, %cst_30 {dimension_numbers = #tpu.dot_dimension_numbers<[1], [1], [0], [0], [0, 0, 1, 0], [], []>} : vector<8x8xf32>, vector<8x8xf32>, vector<8x8xf32> -> vector<8x8xf32>
      %cst_31 = arith.constant dense<0.000000e+00> : vector<8x8xf32>
      %52 = tpu.matmul %50, %50, %cst_31 {dimension_numbers = #tpu.dot_dimension_numbers<[1], [1], [0], [0], [0, 0, 1, 0], [], []>} : vector<8x8xf32>, vector<8x8xf32>, vector<8x8xf32> -> vector<8x8xf32>
      %c0_32 = arith.constant 0 : index
      %c0_33 = arith.constant 0 : index
      %53 = vector.load %arg5[%c0_32, %c0_33] : memref<8x8xf32, #tpu.memory_space<vmem>>, vector<8x8xf32>
      %54 = arith.subf %53, %51 : vector<8x8xf32>
      %55 = arith.mulf %54, %52 : vector<8x8xf32>
      %56 = arith.mulf %35, %35 : vector<8x1xf32>
      %57 = arith.mulf %30, %56 : vector<8x1xf32>
      %58 = arith.mulf %55, %55 : vector<8x8xf32>
      %cst_34 = arith.constant dense<0.000000e+00> : vector<8xf32>
      %59 = vector.multi_reduction <add>, %58, %cst_34 [1] : vector<8x8xf32> to vector<8xf32>
      %60 = vector.shape_cast %59 : vector<8xf32> to vector<8x1xf32>
      %61 = arith.mulf %57, %57 : vector<8x1xf32>
      %62 = arith.subf %60, %61 : vector<8x1xf32>
      %cst_35 = arith.constant 0.142857149 : f32
      %63 = vector.broadcast %cst_35 : f32 to vector<8x1xf32>
      %64 = arith.mulf %62, %63 : vector<8x1xf32>
      %c0_36 = arith.constant 0 : index
      %c0_37 = arith.constant 0 : index
      %c0_38 = arith.constant 0 : index
      %65 = vector.load %arg3[%c0_36, %c0_37, %c0_38] : memref<1x8x1xf32, #tpu.memory_space<vmem>>, vector<1x8x1xf32>
      %66 = vector.shape_cast %65 : vector<1x8x1xf32> to vector<8x1xf32>
      %67 = arith.mulf %64, %66 : vector<8x1xf32>
      %cst_39 = arith.constant dense<0.000000e+00> : vector<1xf32>
      %68 = vector.multi_reduction <add>, %67, %cst_39 [0] : vector<8x1xf32> to vector<1xf32>
      %69 = vector.shape_cast %68 : vector<1xf32> to vector<1x1xf32>
      %cst_40 = arith.constant 1.250000e-01 : f32
      %70 = vector.broadcast %cst_40 : f32 to vector<1x1xf32>
      %71 = arith.mulf %69, %70 : vector<1x1xf32>
      %c0_41 = arith.constant 0 : index
      %c0_42 = arith.constant 0 : index
      %c0_43 = arith.constant 0 : index
      %72 = vector.load %arg4[%c0_41, %c0_42, %c0_43] : memref<1x1x1xf32, #tpu.memory_space<vmem>>, vector<1x1x1xf32>
      %73 = vector.shape_cast %72 : vector<1x1x1xf32> to vector<1x1xf32>
      %74 = vector.shape_cast %71 : vector<1x1xf32> to vector<1x1x1xf32>
      tpu.vector_store %arg4[%c0_41, %c0_42, %c0_43], %74 {strides = array<i32>} : memref<1x1x1xf32, #tpu.memory_space<vmem>>, vector<1x1x1xf32>,
    } else {
    }
    return
  }
  func.func @transform_0(%arg0: i32, %arg1: i32) -> (i32, i32, i32) {
    %c0_i32 = arith.constant 0 : i32
    %c0_i32_0 = arith.constant 0 : i32
    return %arg0, %c0_i32, %arg1 : i32, i32, i32
  }
  func.func @transform_1(%arg0: i32, %arg1: i32) -> (i32, i32, i32) {
    %c0_i32 = arith.constant 0 : i32
    %c0_i32_0 = arith.constant 0 : i32
    %c0_i32_1 = arith.constant 0 : i32
    return %arg0, %c0_i32, %c0_i32_0 : i32, i32, i32
  }
  func.func @transform_2(%arg0: i32, %arg1: i32) -> (i32, i32, i32) {
    %c0_i32 = arith.constant 0 : i32
    %c0_i32_0 = arith.constant 0 : i32
    %c0_i32_1 = arith.constant 0 : i32
    return %arg0, %c0_i32, %c0_i32_0 : i32, i32, i32
  }
}

</mosaic_0001>

<bundles_post_ra>
// kernel: tpu_custom_call.1
= control target key start
LH: loop header
LB: loop body
LE: loop exit
PB: predicated region body
PF: predicated region fallthrough
CT: control target
= control target key end

     0   :  { %s629_s9 = smov 0   ;;  %s631_s10 = smov 0   ;;  %s697_s0 = inlined_call_operand.vmem [shape: f32[2,8,128], index: 0, kind: input, shape index: {}]   ;;  %s698_s1 = inlined_call_operand.vmem [shape: f32[2,8,1], index: 1, kind: input, shape index: {}]   ;;  %s699_s2 = inlined_call_operand.vmem [shape: f32[2,1,1], index: 2, kind: output, shape index: {}]  }
   0x1   :  { %s633_s11 = smov 0  }
   0x2 LB: > { %s24_s12 = sadd.s32 1, %s605_s10  ;;  %p525_p0 = scmp.ge.s32.totalorder %s609_s11, 1  ;;  %s609_s11 = sphi %s633_s11, %s12_s11   ;;  %s605_s10 = sphi %s631_s10, %s701_s10   ;;  %s601_s9 = sphi %s629_s9, %s700_s9  }
   0x3   : > { %p26_p1 = scmp.ge.s32.totalorder %s24_s12, 2  ;;  %p137_p2 = scmp.lt.s32.totalorder %s609_s11, 3 }
   0x5   : > { %s703_s12 = smov (%p26_p1, %s24_s12), 0  ;;  %p138_p3 = pnand %p525_p0, %p137_p2 }
   0x6   : > { %p163_p4 = scmp.lt.s32.totalorder (!%p138_p3), %s601_s9, 1  ;;  %vm184_vm0 = vcmask (!%p138_p3), 7168   ;;  %v611_v0 = vmov (!%p138_p3), 0.0   ;;  %v612_v5 = vmov (!%p138_p3), 0   ;;  %vm613_vm1 = vmmov (!%p138_p3), 0  }
   0x7   : > { %141 = sbr.rel (%p138_p3) target bundleno = 708 (0x2c4), region = 28  ;;  %185 = vst.msk [vmem:[#allocation3] sm:$0xff] (!%p138_p3), %vm184_vm0, %v611_v0  ;;  %186 = vst.msk [vmem:[#allocation4] sm:$0xff] (!%p138_p3), %vm184_vm0, %v611_v0  ;;  %540 = vmatprep.subr.bf16.mxu0 (!%p138_p3), %v611_v0  ;;  %546 = vmatprep.subr.mxu1 (!%p138_p3), %v611_v0  ;;  %vm182_vm2 = vcmask (!%p138_p3), 64512   ;;  %v257_v28 = vlaneseq (!%p138_p3)  ;;  %vm449_vm4 = vcmask (!%p138_p3), 0  }
   0x8   : > { %583 = vset.pattern.permute.xlu1 (!%p138_p3), %v612_v5  ;;  %584 = vset.pattern.permute.xlu0 (!%p138_p3), %v612_v5  ;;  %183 = vst.msk [vmem:[#allocation2] sm:$0xff] (!%p138_p3), %vm182_vm2, %v611_v0 }
   0x9   : > { %542 = vmatprep.mubr.msk.bf16.mxu0 (!%p138_p3), %vm613_vm1, %v611_v0  ;;  %548 = vmatprep.mubr.msk.f32.mxu1 (!%p138_p3), %vm613_vm1, %v611_v0  ;;  %v258_v29 = vand.u32 (!%p138_p3), 127, %v257_v28 }
   0xb   : > { %vm259_vm3 = vcmp.eq.s32.totalorder (!%p138_p3), %v258_v29, 0 }
   0xe   : > { %s705_s9 = smov (!%p163_p4, %s601_s9), 1  ;;  %v234_v6 = vld [vmem:[#allocation3] sm:$0xff]  ;;  %v240_v9 = vld [vmem:[#allocation4] sm:$0xff] }
   0xf   : > { %s526_s13 = sshll.u32 %s705_s9, 3  ;;  %v190_v22 = vld [vmem:[#allocation2] sm:$0xff]  ;;  %s176_s22 = scalar_lea.vmem %s699_s2, %s705_s9 }
  0x10   : > { %s169_s16 = scalar_lea.vmem %s697_s0, %s526_s13  ;;  %s173_s19 = scalar_lea.vmem %s698_s1, %s526_s13 }
  0x11   : > { %v187_v1 = vld [vmem:[%s169_s16] sm:$0xff] }
  0x12   : > { %v188_v2 = vpack.c.bf16 %v187_v1, %v187_v1  ;;  %v439_v48 = vld [vmem:[%s173_s19] sm:$0xff] }
  0x14   : > { %v189_v3 = vunpack.c.l.bf16 %v188_v2  ;;  %541 = vmatpush3.bf16.xpose.msra.mxu0 %v188_v2 }
  0x16   : > { %235 = vadd.xlane.f32.xlu0 %v189_v3  ;;  %v241_v4 = vmul.f32 %v189_v3, %v189_v3 }
  0x1a   : > { %242 = vadd.xlane.f32.xlu0 %v241_v4 }
  0x1b   : > { %543 = vmatmul.mubr.bf16.vlgmr.msra.gmra.mrb[0].mxu0 %v188_v2 }
  0xa3   : > { %v236_v7 = vpop.xlane.xlu0 %235 }
  0xa4   : > { %v237_v8 = vadd.f32 %v236_v7, %v234_v6 }
  0xa6   : > { %239 = vst.msk [vmem:[#allocation3] sm:$0xff] %vm184_vm0, %v237_v8 }
  0xa7   : > { %v243_v10 = vpop.xlane.xlu0 %242 }
  0xa8   : > { %v244_v11 = vadd.f32 %v243_v10, %v240_v9 }
  0xaa   : > { %245 = vst.msk [vmem:[#allocation4] sm:$0xff] %vm184_vm0, %v244_v11 }
  0xad   : > { %v249_v12 = vld [vmem:[#allocation3] sm:$0xff] }
  0xae   : > { %268 = vperm.xlu1 %583, %v249_v12   ;;  %v251_v13 = vmul.f32 0.027777778, %v249_v12 }
  0xb0   : > { %v252_v14 = vmul.f32 %v251_v13, %v249_v12 }
  0xb1   : > { %v250_v15 = vld [vmem:[#allocation4] sm:$0xff] }
  0xb2   : > { %v253_v16 = vsub.f32 %v250_v15, %v252_v14  ;;  %262 = vperm.xlu1 %583, %v251_v13  }
  0xb4   : > { %v254_v17 = vmul.f32 0.028571429, %v253_v16 }
  0xb6   : > { %v255_v18 = vmax.f32 %v254_v17, 1e-30 }
  0xb8   : > { %585 = vrsqrt.f32 %v255_v18 }
  0xc2   : > { %v586_v19 = vpop.eup %585 }
  0xc3   : > { %274 = vperm.xlu0 %584, %v586_v19   ;;  %v430_v20 = vmul.f32 %v586_v19, %v586_v19 }
  0xc5   : > { %v431_v21 = vmul.f32 %v430_v20, %v253_v16 }
  0xc7   : > { %v436_v45 = vmul.f32 %v431_v21, %v431_v21 }
  0xee   : > { %v225_v23 = vpop.f32.mrb[0].mxu0 }
  0xef   : > { %v231_v24 = vadd.f32 %v225_v23, %v190_v22  ;;  %v544_v25 = vpop.f32.mrb[1].mxu0 }
  0xf0   : > { %v228_v26 = vpop.f32.mrb[2].mxu0 }
  0xf1   : > { %233 = vst.msk [vmem:[#allocation2] sm:$0xff] %vm182_vm2, %v231_v24  ;;  %v545_v27 = vpop.f32.mrb[3].mxu0 }
  0xf8   : > { %v427_v38 = vld [vmem:[#allocation2] sm:$0xff] }
 0x12d   : > { %v269_v30 = vpop.permute.xlu1 %268 }
 0x12e   : > { %v271_v31 = vsel %vm259_vm3, %v269_v30, 0.0 }
 0x12f   : > { %547 = vmatpush3.xpose.msk.msra.mxu1 %vm182_vm2, %v271_v31 }
 0x130   : > { %551 = vmatprep.subr.mxu1 %v611_v0 }
 0x131   : > { %v263_v32 = vpop.permute.xlu1 %262 }
 0x132   : > { %v265_v33 = vsel %vm259_vm3, %v263_v32, 0.0 }
 0x133   : > { %549 = vmatmul.mubr.msk.f32.vlgmr.msra.gmra.mrb[0].mxu1 %vm182_vm2, %v265_v33 }
 0x134   : > { %553 = vmatprep.mubr.msk.f32.mxu1 %vm613_vm1, %v611_v0 }
 0x142   : > { %v275_v34 = vpop.permute.xlu0 %274 }
 0x143   : > { %v277_v35 = vsel %vm259_vm3, %v275_v34, 0.0 }
 0x144   : > { %552 = vmatpush3.xpose.msk.msra.mxu1 %vm182_vm2, %v277_v35 }
 0x147   : > { %554 = vmatmul.mubr.msk.f32.vlgmr.msra.gmra.mrb[2].mxu1 %vm182_vm2, %v277_v35 }
 0x206   : > { %v350_v36 = vpop.f32.mrb[0].mxu1 }
 0x207   : > { %v550_v37 = vpop.f32.mrb[1].mxu1  ;;  %v428_v39 = vsub.f32 %v427_v38, %v350_v36 }
 0x21a   : > { %v423_v40 = vpop.f32.mrb[2].mxu1 }
 0x21b   : > { %v429_v41 = vmul.f32 %v428_v39, %v423_v40  ;;  %v555_v42 = vpop.f32.mrb[3].mxu1 }
 0x21d   : > { %v432_v43 = vmul.f32 %v429_v41, %v429_v41 }
 0x21f   : > { %v433_v44 = vsel %vm182_vm2, %v432_v43, 0.0 }
 0x220   : > { %434 = vadd.xlane.f32.xlu1 %v433_v44 }
 0x2ad   : > { %v435_v46 = vpop.xlane.xlu1 %434 }
 0x2ae   : > { %v437_v47 = vsub.f32 %v435_v46, %v436_v45 }
 0x2b0   : > { %v438_v49 = vmul.f32 0.14285715, %v437_v47 }
 0x2b2   : > { %v440_v50 = vmul.f32 %v439_v48, %v438_v49 }
 0x2b4   : > { %v441_v51 = vsel %vm184_vm0, %v440_v50, 0.0 }
 0x2b5   : > { %v442_v52 = vrot.slane %v441_v51, 4 }
 0x2b7   : > { %v443_v53 = vadd.f32 %v442_v52, %v441_v51 }
 0x2b9   : > { %v444_v54 = vrot.slane %v443_v53, 2 }
 0x2bb   : > { %v445_v55 = vadd.f32 %v444_v54, %v443_v53 }
 0x2bd   : > { %v446_v56 = vrot.slane %v445_v55, 1 }
 0x2bf   : > { %v447_v57 = vadd.f32 %v446_v56, %v445_v55 }
 0x2c1   : > { %v448_v58 = vmul.f32 0.125, %v447_v57 }
 0x2c3   : > { %450 = vst.msk [vmem:[%s176_s22] sm:$0x1] %vm449_vm4, %v448_v58 }
 0x2c4 PF: > { %s12_s11 = sadd.s32 1, %s609_s11   ;;  %s700_s9 = smov %s605_s10 }
 0x2c5   : > { %p9_p5 = scmp.ge.s32.totalorder %s12_s11, 4   ;;  %s701_s10 = smov %s703_s12 }
 0x2c7   :  { %11 = sbr.rel (!%p9_p5) target bundleno = 2 (0x2), region = 69 }

</bundles_post_ra>
